<compile_context>
chip_gen: v7x
topology: tpu7x:2x2x1
jax: 0.10.0
libtpu: 0.0.40
codegen_flags: <defaults>
</compile_context>

<pallas_src>
import functools

import jax
import jax.numpy as jnp
from jax import lax
from jax.experimental import pallas as pl
from jax.experimental.pallas import tpu as pltpu

_BN_EPS = 1e-5
_TARGET_BLOCK_BYTES = 4 << 20   # ~4 MiB x blocks -> near HBM roofline everywhere
_MAX_BATCH_TILE = 16            # bound for the unrolled in-kernel batch loop


# ---------------------------------------------------------------------------
# Kernels (feature-major: features on sublanes, pixels on lanes)
# ---------------------------------------------------------------------------

def _bn_stats1_kernel(x_ref, w1_ref, b1_ref, s_ref, q_ref, *, tp, valid_hw):
    """Per-batch-tile sum / sum-of-squares of h1 = W1 @ x + b1."""
    @pl.when(pl.program_id(1) == 0)
    def _init():
        s_ref[...] = jnp.zeros_like(s_ref)
        q_ref[...] = jnp.zeros_like(q_ref)

    w1 = w1_ref[...]
    b1 = b1_ref[...]
    c1 = w1.shape[0]
    if valid_hw is not None:      # mask pixels added by lane padding (static branch)
        col = pl.program_id(1) * tp + lax.broadcasted_iota(jnp.int32, (1, tp), 1)
        mask = col < valid_hw
    s_acc = jnp.zeros((c1, 1), jnp.float32)
    q_acc = jnp.zeros((c1, 1), jnp.float32)
    for b in range(x_ref.shape[0]):               # short unrolled batch-tile loop
        h1 = jnp.dot(w1, x_ref[b], preferred_element_type=jnp.float32) + b1
        if valid_hw is not None:
            h1 = jnp.where(mask, h1, 0.0)
        s_acc = s_acc + jnp.sum(h1, axis=1, keepdims=True)
        q_acc = q_acc + jnp.sum(h1 * h1, axis=1, keepdims=True)
    s_ref[0] += s_acc
    q_ref[0] += q_acc


def _bn_stats2_kernel(x_ref, w1f_ref, b1f_ref, w2_ref, b2_ref, s_ref, q_ref,
                      *, tp, valid_hw):
    """BN1 already folded into (w1f, b1f); per-batch-tile stats of h2."""
    @pl.when(pl.program_id(1) == 0)
    def _init():
        s_ref[...] = jnp.zeros_like(s_ref)
        q_ref[...] = jnp.zeros_like(q_ref)

    w1f = w1f_ref[...]
    b1f = b1f_ref[...]
    w2 = w2_ref[...]
    b2 = b2_ref[...]
    c2 = w2.shape[0]
    if valid_hw is not None:
        col = pl.program_id(1) * tp + lax.broadcasted_iota(jnp.int32, (1, tp), 1)
        mask = col < valid_hw
    s_acc = jnp.zeros((c2, 1), jnp.float32)
    q_acc = jnp.zeros((c2, 1), jnp.float32)
    for b in range(x_ref.shape[0]):
        a1 = jnp.maximum(
            jnp.dot(w1f, x_ref[b], preferred_element_type=jnp.float32) + b1f, 0.0)
        h2 = jnp.dot(w2, a1, preferred_element_type=jnp.float32) + b2
        if valid_hw is not None:
            h2 = jnp.where(mask, h2, 0.0)
        s_acc = s_acc + jnp.sum(h2, axis=1, keepdims=True)
        q_acc = q_acc + jnp.sum(h2 * h2, axis=1, keepdims=True)
    s_ref[0] += s_acc
    q_ref[0] += q_acc


def _final_kernel(x_ref, w1f_ref, b1f_ref, w2f_ref, b2f_ref, w3_ref, b3_ref, o_ref):
    """Fused forward with both BatchNorms folded into the linears."""
    w1f = w1f_ref[...]
    b1f = b1f_ref[...]
    w2f = w2f_ref[...]
    b2f = b2f_ref[...]
    w3 = w3_ref[...]
    b3 = b3_ref[...]
    for b in range(x_ref.shape[0]):               # short unrolled batch-tile loop
        a1 = jnp.maximum(
            jnp.dot(w1f, x_ref[b], preferred_element_type=jnp.float32) + b1f, 0.0)
        a2 = jnp.maximum(
            jnp.dot(w2f, a1, preferred_element_type=jnp.float32) + b2f, 0.0)
        # Linear(C2 -> 1): VPU multiply + tiny sublane reduction (no 1-wide MXU).
        logits = jnp.sum(a2 * w3, axis=0, keepdims=True) + b3       # (1, TP)
        # exp rides the EUP; lane-dense (1, TP) store.  (pl.reciprocal(approx=True)
        # is available once pass 3 stops being DMA-bound; kept exact here.)
        o_ref[b] = 1.0 / (1.0 + jnp.exp(-logits))


# ---------------------------------------------------------------------------
# Host-side helpers
# ---------------------------------------------------------------------------

def _pick_tiles(batch, channels, hw_pad, itemsize, target_bytes):
    """Choose (batch_tile, pixel_tile) so one x block is ~target_bytes."""
    px_bytes = channels * itemsize
    n128 = hw_pad // 128
    max_lanes = max(target_bytes // px_bytes, 128)
    tp = 128
    for k in range(n128, 0, -1):                  # largest 128-multiple divisor
        if n128 % k == 0 and 128 * k <= max_lanes:
            tp = 128 * k
            break
    # If one pixel tile already covers the whole image but is still small,
    # also tile the batch (kernels unroll a short loop over it).
    tb = 1
    if tp == hw_pad:
        per_image = px_bytes * hw_pad
        want = max(int(target_bytes // max(per_image, 1)), 1)
        want = min(want, batch, _MAX_BATCH_TILE)
        for k in range(want, 0, -1):
            if batch % k == 0:
                tb = k
                break
    return tb, tp


def _vmem_limit_bytes(tb, c, c1, c2, tp, x_itemsize):
    """Explicit, generation-aware VMEM budget."""
    f32 = 4
    x_block = tb * c * tp * x_itemsize
    out_block = tb * tp * f32
    acts = (c1 + c2 + 1) * tp * f32
    weights = (c1 * c + c2 * c1 + 3 * c2 + 2 * c1 + 2) * f32
    need = 2 * x_block + 2 * out_block + 4 * acts + 2 * weights + (4 << 20)
    try:
        cap = pltpu.get_tpu_info().vmem_capacity_bytes
    except Exception:
        cap = 64 << 20            # conservative fallback (v7x physical size)
    return int(min(max(need, 16 << 20), (cap * 3) // 4))


def _fold_bn(s, q, n, w, b, gamma, beta, eps):
    """Fold training-mode BatchNorm (batch stats from sum/sumsq) into a linear.

    BN(Wx + b) == (W*scale) x + ((b - mu)*scale + beta), scale = gamma/sqrt(var+eps).
    TODO(synk): switch to a shifted/Welford-style accumulation if N grows large
    enough for E[h^2]-E[h]^2 cancellation to matter.
    """
    mu = s / n
    var = jnp.maximum(q / n - mu * mu, 0.0)       # biased variance (PyTorch norm)
    scale = gamma * lax.rsqrt(var + eps)          # (Cout, 1)
    return w * scale, (b - mu) * scale + beta


def improved_discriminator_forward(x_nchw, params, *, bn_eps=_BN_EPS,
                                   stream_bf16=False,
                                   target_block_bytes=_TARGET_BLOCK_BYTES):
    """x_nchw: (B, C, H, W) float32.  Returns (B, 1, H, W) float32."""
    B, C, H, W = x_nchw.shape
    HW = H * W
    N = B * HW
    C1, C2 = C // 2, C // 4

    # Free reshape (collapses trailing dims, keeps NCHW order) -> no transpose,
    # no extra HBM round trip; pixels land on the lane axis inside the kernels.
    x3 = x_nchw.reshape(B, C, HW)

    # Pad the pixel axis to a lane multiple so blocks are always 128-aligned
    # (padded pixels are masked out of the BN stats and sliced off the output).
    hw_pad = ((HW + 127) // 128) * 128
    valid_hw = None
    if hw_pad != HW:
        x3 = jnp.pad(x3, ((0, 0), (0, 0), (0, hw_pad - HW)))
        valid_hw = HW

    if stream_bf16:
        # Optional: halves x HBM bytes on all three passes; deviates slightly
        # from the f32 PyTorch reference, so off by default.
        x3 = x3.astype(jnp.bfloat16)

    tb, tp = _pick_tiles(B, C, hw_pad, x3.dtype.itemsize, target_block_bytes)
    nb, npx = B // tb, hw_pad // tp
    grid = (nb, npx)

    x_spec = pl.BlockSpec((tb, C, tp), lambda b, p: (b, 0, p))

    def resident(shape):
        # Full-array block + constant index map -> DMA'd once, stays in VMEM.
        return pl.BlockSpec(shape, lambda b, p: (0,) * len(shape))

    vlim = _vmem_limit_bytes(tb, C, C1, C2, tp, x3.dtype.itemsize)
    cp_stats = pltpu.CompilerParams(
        dimension_semantics=("parallel", "arbitrary"), vmem_limit_bytes=vlim)
    cp_final = pltpu.CompilerParams(
        dimension_semantics=("parallel", "parallel"), vmem_limit_bytes=vlim)

    # ---- Pass 1: per-batch-tile statistics of h1 = W1 x + b1 ----------------
    s1p, q1p = pl.pallas_call(
        functools.partial(_bn_stats1_kernel, tp=tp, valid_hw=valid_hw),
        grid=grid,
        out_shape=(jax.ShapeDtypeStruct((nb, C1, 1), jnp.float32),
                   jax.ShapeDtypeStruct((nb, C1, 1), jnp.float32)),
        in_specs=[x_spec, resident((C1, C)), resident((C1, 1))],
        out_specs=(pl.BlockSpec((1, C1, 1), lambda b, p: (b, 0, 0)),
                   pl.BlockSpec((1, C1, 1), lambda b, p: (b, 0, 0))),
        compiler_params=cp_stats,
    )(x3, params["w1"], params["b1"])
    w1f, b1f = _fold_bn(jnp.sum(s1p, axis=0), jnp.sum(q1p, axis=0), N,
                        params["w1"], params["b1"],
                        params["g1"], params["be1"], bn_eps)

    # ---- Pass 2: per-batch-tile statistics of h2 = W2 relu(BN1(.)) + b2 -----
    s2p, q2p = pl.pallas_call(
        functools.partial(_bn_stats2_kernel, tp=tp, valid_hw=valid_hw),
        grid=grid,
        out_shape=(jax.ShapeDtypeStruct((nb, C2, 1), jnp.float32),
                   jax.ShapeDtypeStruct((nb, C2, 1), jnp.float32)),
        in_specs=[x_spec, resident((C1, C)), resident((C1, 1)),
                  resident((C2, C1)), resident((C2, 1))],
        out_specs=(pl.BlockSpec((1, C2, 1), lambda b, p: (b, 0, 0)),
                   pl.BlockSpec((1, C2, 1), lambda b, p: (b, 0, 0))),
        compiler_params=cp_stats,
    )(x3, w1f, b1f, params["w2"], params["b2"])
    w2f, b2f = _fold_bn(jnp.sum(s2p, axis=0), jnp.sum(q2p, axis=0), N,
                        params["w2"], params["b2"],
                        params["g2"], params["be2"], bn_eps)

    # ---- Pass 3: fused forward, lane-dense (TB, 1, TP) output blocks --------
    out = pl.pallas_call(
        _final_kernel,
        grid=grid,
        out_shape=jax.ShapeDtypeStruct((B, 1, hw_pad), jnp.float32),
        in_specs=[x_spec, resident((C1, C)), resident((C1, 1)),
                  resident((C2, C1)), resident((C2, 1)),
                  resident((C2, 1)), resident((1, 1))],
        out_specs=pl.BlockSpec((tb, 1, tp), lambda b, p: (b, 0, p)),
        compiler_params=cp_final,
    )(x3, w1f, b1f, w2f, b2f, params["w3"], params["b3"])

    out = out[:, :, :HW]                     # drop lane padding (no-op if aligned)
    return out.reshape(B, 1, H, W)


# ---------------------------------------------------------------------------
# Parameters (PyTorch-style init & layouts) and pure-JAX reference
# ---------------------------------------------------------------------------

def init_params(key, in_channels):
    """Linear weights in PyTorch (out, in) layout; biases / BN params as (out, 1)
    columns (lane-broadcast in the feature-major kernels).  w3 stored as (C/4, 1)."""
    c1, c2 = in_channels // 2, in_channels // 4
    ks = jax.random.split(key, 6)

    def lin(kw, kb, fan_in, fan_out):
        bound = 1.0 / jnp.sqrt(fan_in)
        w = jax.random.uniform(kw, (fan_out, fan_in), jnp.float32, -bound, bound)
        b = jax.random.uniform(kb, (fan_out, 1), jnp.float32, -bound, bound)
        return w, b

    w1, b1 = lin(ks[0], ks[1], in_channels, c1)
    w2, b2 = lin(ks[2], ks[3], c1, c2)
    w3, b3 = lin(ks[4], ks[5], c2, 1)
    return {
        "w1": w1, "b1": b1,
        "g1": jnp.ones((c1, 1), jnp.float32), "be1": jnp.zeros((c1, 1), jnp.float32),
        "w2": w2, "b2": b2,
        "g2": jnp.ones((c2, 1), jnp.float32), "be2": jnp.zeros((c2, 1), jnp.float32),
        "w3": jnp.transpose(w3), "b3": b3,                  # (c2, 1), (1, 1)
    }


def _reference_forward(x_nchw, params):
    """Pure-JAX reference written exactly like the PyTorch module."""
    B, C, H, W = x_nchw.shape
    x = jnp.transpose(x_nchw, (0, 2, 3, 1)).reshape(-1, C)

    def bn(h, g, be):
        mu = jnp.mean(h, axis=0, keepdims=True)
        var = jnp.mean((h - mu) ** 2, axis=0, keepdims=True)
        return (h - mu) / jnp.sqrt(var + _BN_EPS) * g + be

    h = jnp.maximum(bn(x @ params["w1"].T + params["b1"].T,
                       params["g1"].T, params["be1"].T), 0.0)
    h = jnp.maximum(bn(h @ params["w2"].T + params["b2"].T,
                       params["g2"].T, params["be2"].T), 0.0)
    y = jax.nn.sigmoid(h @ params["w3"] + params["b3"])
    return jnp.transpose(y.reshape(B, H, W, 1), (0, 3, 1, 2))


if __name__ == "__main__":
    key = jax.random.PRNGKey(0)
    fwd = jax.jit(improved_discriminator_forward)

    # Primary case: lane-aligned spatial extent (exercises the batch-tiled path).
    k_x, k_p = jax.random.split(key)
    B, C, H, W = 2, 16, 16, 16            # in_channels=16 -> hidden 8 -> 4 -> 1
    x = jax.random.normal(k_x, (B, C, H, W), jnp.float32)
    params = init_params(k_p, C)
    out = jax.block_until_ready(fwd(x, params))
    ref = _reference_forward(x, params)
    assert out.shape == (B, 1, H, W), out.shape
    max_err = float(jnp.max(jnp.abs(out - ref)))
    assert max_err < 1e-4, max_err

    # Secondary case: non-128-multiple H*W (exercises the pad + mask path).
    k_x2, k_p2 = jax.random.split(jax.random.PRNGKey(1))
    B2, C2_, H2, W2 = 2, 8, 10, 10
    x2 = jax.random.normal(k_x2, (B2, C2_, H2, W2), jnp.float32)
    params2 = init_params(k_p2, C2_)
    out2 = jax.block_until_ready(
        jax.jit(improved_discriminator_forward)(x2, params2))
    ref2 = _reference_forward(x2, params2)
    assert out2.shape == (B2, 1, H2, W2), out2.shape
    max_err2 = float(jnp.max(jnp.abs(out2 - ref2)))
    assert max_err2 < 1e-4, max_err2

    print("KERNEL_OK")
</pallas_src>

<mosaic_0001>
module attributes {stable_mosaic.version = 11 : i64} {
  func.func @_bn_stats1_kernel(%arg0: i32, %arg1: i32, %arg2: memref<2x16x256xf32, #tpu.memory_space<vmem>>, %arg3: memref<8x16xf32, #tpu.memory_space<vmem>>, %arg4: memref<8x1xf32, #tpu.memory_space<vmem>>, %arg5: memref<1x8x1xf32, #tpu.memory_space<vmem>>, %arg6: memref<1x8x1xf32, #tpu.memory_space<vmem>>) attributes {dimension_semantics = [#tpu.dimension_semantics<parallel>, #tpu.dimension_semantics<arbitrary>], iteration_bounds = array<i64: 1, 1>, scalar_prefetch = 0 : i64, scratch_operands = 0 : i64, tpu.core_type = #tpu.core_type<tc>, window_params = [{transform_indices = @transform_0, window_bounds = array<i64: 2, 16, 256>}, {pipeline_mode = #tpu.pipeline_mode<synchronous>, transform_indices = @transform_1, window_bounds = array<i64: 8, 16>}, {pipeline_mode = #tpu.pipeline_mode<synchronous>, transform_indices = @transform_2, window_bounds = array<i64: 8, 1>}, {transform_indices = @transform_3, window_bounds = array<i64: 1, 8, 1>}, {transform_indices = @transform_4, window_bounds = array<i64: 1, 8, 1>}]} {
    %c0_i32 = arith.constant 0 : i32
    %0 = arith.cmpi eq, %arg1, %c0_i32 : i32
    %1 = arith.extui %0 : i1 to i32
    %c0_i32_0 = arith.constant 0 : i32
    %2 = arith.cmpi ne, %1, %c0_i32_0 : i32
    scf.if %2 {
      %cst_28 = arith.constant 0.000000e+00 : f32
      %43 = vector.broadcast %cst_28 : f32 to vector<1x8x1xf32>
      %c0_29 = arith.constant 0 : index
      %c0_30 = arith.constant 0 : index
      %c0_31 = arith.constant 0 : index
      %44 = vector.load %arg5[%c0_29, %c0_30, %c0_31] : memref<1x8x1xf32, #tpu.memory_space<vmem>>, vector<1x8x1xf32>
      tpu.vector_store %arg5[%c0_29, %c0_30, %c0_31], %43 {strides = array<i32>} : memref<1x8x1xf32, #tpu.memory_space<vmem>>, vector<1x8x1xf32>,
      %cst_32 = arith.constant 0.000000e+00 : f32
      %45 = vector.broadcast %cst_32 : f32 to vector<1x8x1xf32>
      %c0_33 = arith.constant 0 : index
      %c0_34 = arith.constant 0 : index
      %c0_35 = arith.constant 0 : index
      %46 = vector.load %arg6[%c0_33, %c0_34, %c0_35] : memref<1x8x1xf32, #tpu.memory_space<vmem>>, vector<1x8x1xf32>
      tpu.vector_store %arg6[%c0_33, %c0_34, %c0_35], %45 {strides = array<i32>} : memref<1x8x1xf32, #tpu.memory_space<vmem>>, vector<1x8x1xf32>,
    } else {
    }
    %c0 = arith.constant 0 : index
    %c0_1 = arith.constant 0 : index
    %3 = vector.load %arg3[%c0, %c0_1] : memref<8x16xf32, #tpu.memory_space<vmem>>, vector<8x16xf32>
    %c0_2 = arith.constant 0 : index
    %c0_3 = arith.constant 0 : index
    %4 = vector.load %arg4[%c0_2, %c0_3] : memref<8x1xf32, #tpu.memory_space<vmem>>, vector<8x1xf32>
    %cst = arith.constant 0.000000e+00 : f32
    %5 = vector.broadcast %cst : f32 to vector<8x1xf32>
    %cst_4 = arith.constant 0.000000e+00 : f32
    %6 = vector.broadcast %cst_4 : f32 to vector<8x1xf32>
    %c0_5 = arith.constant 0 : index
    %c0_6 = arith.constant 0 : index
    %c0_7 = arith.constant 0 : index
    %7 = vector.load %arg2[%c0_5, %c0_6, %c0_7] : memref<2x16x256xf32, #tpu.memory_space<vmem>>, vector<1x16x256xf32>
    %8 = vector.shape_cast %7 : vector<1x16x256xf32> to vector<16x256xf32>
    %cst_8 = arith.constant dense<0.000000e+00> : vector<8x256xf32>
    %9 = tpu.matmul %3, %8, %cst_8 {dimension_numbers = #tpu.dot_dimension_numbers<[1], [0], [0], [1], [0, 0, 1, 1], [], []>} : vector<8x16xf32>, vector<16x256xf32>, vector<8x256xf32> -> vector<8x256xf32>
    %10 = vector.broadcast %4 : vector<8x1xf32> to vector<8x256xf32>
    %11 = arith.addf %9, %10 : vector<8x256xf32>
    %cst_9 = arith.constant dense<0.000000e+00> : vector<8xf32>
    %12 = vector.multi_reduction <add>, %11, %cst_9 [1] : vector<8x256xf32> to vector<8xf32>
    %13 = vector.shape_cast %12 : vector<8xf32> to vector<8x1xf32>
    %14 = arith.addf %5, %13 : vector<8x1xf32>
    %15 = arith.mulf %11, %11 : vector<8x256xf32>
    %cst_10 = arith.constant dense<0.000000e+00> : vector<8xf32>
    %16 = vector.multi_reduction <add>, %15, %cst_10 [1] : vector<8x256xf32> to vector<8xf32>
    %17 = vector.shape_cast %16 : vector<8xf32> to vector<8x1xf32>
    %18 = arith.addf %6, %17 : vector<8x1xf32>
    %c1 = arith.constant 1 : index
    %c0_11 = arith.constant 0 : index
    %c0_12 = arith.constant 0 : index
    %19 = vector.load %arg2[%c1, %c0_11, %c0_12] : memref<2x16x256xf32, #tpu.memory_space<vmem>>, vector<1x16x256xf32>
    %20 = vector.shape_cast %19 : vector<1x16x256xf32> to vector<16x256xf32>
    %cst_13 = arith.constant dense<0.000000e+00> : vector<8x256xf32>
    %21 = tpu.matmul %3, %20, %cst_13 {dimension_numbers = #tpu.dot_dimension_numbers<[1], [0], [0], [1], [0, 0, 1, 1], [], []>} : vector<8x16xf32>, vector<16x256xf32>, vector<8x256xf32> -> vector<8x256xf32>
    %22 = vector.broadcast %4 : vector<8x1xf32> to vector<8x256xf32>
    %23 = arith.addf %21, %22 : vector<8x256xf32>
    %cst_14 = arith.constant dense<0.000000e+00> : vector<8xf32>
    %24 = vector.multi_reduction <add>, %23, %cst_14 [1] : vector<8x256xf32> to vector<8xf32>
    %25 = vector.shape_cast %24 : vector<8xf32> to vector<8x1xf32>
    %26 = arith.addf %14, %25 : vector<8x1xf32>
    %27 = arith.mulf %23, %23 : vector<8x256xf32>
    %cst_15 = arith.constant dense<0.000000e+00> : vector<8xf32>
    %28 = vector.multi_reduction <add>, %27, %cst_15 [1] : vector<8x256xf32> to vector<8xf32>
    %29 = vector.shape_cast %28 : vector<8xf32> to vector<8x1xf32>
    %30 = arith.addf %18, %29 : vector<8x1xf32>
    %c0_16 = arith.constant 0 : index
    %c0_17 = arith.constant 0 : index
    %c0_18 = arith.constant 0 : index
    %31 = vector.load %arg5[%c0_16, %c0_17, %c0_18] : memref<1x8x1xf32, #tpu.memory_space<vmem>>, vector<1x8x1xf32>
    %32 = vector.shape_cast %31 : vector<1x8x1xf32> to vector<8x1xf32>
    %33 = arith.addf %32, %26 : vector<8x1xf32>
    %c0_19 = arith.constant 0 : index
    %c0_20 = arith.constant 0 : index
    %c0_21 = arith.constant 0 : index
    %34 = vector.load %arg5[%c0_19, %c0_20, %c0_21] : memref<1x8x1xf32, #tpu.memory_space<vmem>>, vector<1x8x1xf32>
    %35 = vector.shape_cast %34 : vector<1x8x1xf32> to vector<8x1xf32>
    %36 = vector.shape_cast %33 : vector<8x1xf32> to vector<1x8x1xf32>
    tpu.vector_store %arg5[%c0_19, %c0_20, %c0_21], %36 {strides = array<i32>} : memref<1x8x1xf32, #tpu.memory_space<vmem>>, vector<1x8x1xf32>,
    %c0_22 = arith.constant 0 : index
    %c0_23 = arith.constant 0 : index
    %c0_24 = arith.constant 0 : index
    %37 = vector.load %arg6[%c0_22, %c0_23, %c0_24] : memref<1x8x1xf32, #tpu.memory_space<vmem>>, vector<1x8x1xf32>
    %38 = vector.shape_cast %37 : vector<1x8x1xf32> to vector<8x1xf32>
    %39 = arith.addf %38, %30 : vector<8x1xf32>
    %c0_25 = arith.constant 0 : index
    %c0_26 = arith.constant 0 : index
    %c0_27 = arith.constant 0 : index
    %40 = vector.load %arg6[%c0_25, %c0_26, %c0_27] : memref<1x8x1xf32, #tpu.memory_space<vmem>>, vector<1x8x1xf32>
    %41 = vector.shape_cast %40 : vector<1x8x1xf32> to vector<8x1xf32>
    %42 = vector.shape_cast %39 : vector<8x1xf32> to vector<1x8x1xf32>
    tpu.vector_store %arg6[%c0_25, %c0_26, %c0_27], %42 {strides = array<i32>} : memref<1x8x1xf32, #tpu.memory_space<vmem>>, vector<1x8x1xf32>,
    return
  }
  func.func @transform_0(%arg0: i32, %arg1: i32) -> (i32, i32, i32) {
    %c0_i32 = arith.constant 0 : i32
    %c0_i32_0 = arith.constant 0 : i32
    return %arg0, %c0_i32, %arg1 : i32, i32, i32
  }
  func.func @transform_1(%arg0: i32, %arg1: i32) -> (i32, i32) {
    %c0_i32 = arith.constant 0 : i32
    %c0_i32_0 = arith.constant 0 : i32
    %c0_i32_1 = arith.constant 0 : i32
    return %c0_i32, %c0_i32_0 : i32, i32
  }
  func.func @transform_2(%arg0: i32, %arg1: i32) -> (i32, i32) {
    %c0_i32 = arith.constant 0 : i32
    %c0_i32_0 = arith.constant 0 : i32
    %c0_i32_1 = arith.constant 0 : i32
    return %c0_i32, %c0_i32_0 : i32, i32
  }
  func.func @transform_3(%arg0: i32, %arg1: i32) -> (i32, i32, i32) {
    %c0_i32 = arith.constant 0 : i32
    %c0_i32_0 = arith.constant 0 : i32
    %c0_i32_1 = arith.constant 0 : i32
    return %arg0, %c0_i32, %c0_i32_0 : i32, i32, i32
  }
  func.func @transform_4(%arg0: i32, %arg1: i32) -> (i32, i32, i32) {
    %c0_i32 = arith.constant 0 : i32
    %c0_i32_0 = arith.constant 0 : i32
    %c0_i32_1 = arith.constant 0 : i32
    return %arg0, %c0_i32, %c0_i32_0 : i32, i32, i32
  }
}

module attributes {stable_mosaic.version = 11 : i64} {
  func.func @_bn_stats2_kernel(%arg0: i32, %arg1: i32, %arg2: memref<2x16x256xf32, #tpu.memory_space<vmem>>, %arg3: memref<8x16xf32, #tpu.memory_space<vmem>>, %arg4: memref<8x1xf32, #tpu.memory_space<vmem>>, %arg5: memref<4x8xf32, #tpu.memory_space<vmem>>, %arg6: memref<4x1xf32, #tpu.memory_space<vmem>>, %arg7: memref<1x4x1xf32, #tpu.memory_space<vmem>>, %arg8: memref<1x4x1xf32, #tpu.memory_space<vmem>>) attributes {dimension_semantics = [#tpu.dimension_semantics<parallel>, #tpu.dimension_semantics<arbitrary>], iteration_bounds = array<i64: 1, 1>, scalar_prefetch = 0 : i64, scratch_operands = 0 : i64, tpu.core_type = #tpu.core_type<tc>, window_params = [{transform_indices = @transform_0, window_bounds = array<i64: 2, 16, 256>}, {pipeline_mode = #tpu.pipeline_mode<synchronous>, transform_indices = @transform_1, window_bounds = array<i64: 8, 16>}, {pipeline_mode = #tpu.pipeline_mode<synchronous>, transform_indices = @transform_2, window_bounds = array<i64: 8, 1>}, {pipeline_mode = #tpu.pipeline_mode<synchronous>, transform_indices = @transform_3, window_bounds = array<i64: 4, 8>}, {pipeline_mode = #tpu.pipeline_mode<synchronous>, transform_indices = @transform_4, window_bounds = array<i64: 4, 1>}, {transform_indices = @transform_5, window_bounds = array<i64: 1, 4, 1>}, {transform_indices = @transform_6, window_bounds = array<i64: 1, 4, 1>}]} {
    %c0_i32 = arith.constant 0 : i32
    %0 = arith.cmpi eq, %arg1, %c0_i32 : i32
    %1 = arith.extui %0 : i1 to i32
    %c0_i32_0 = arith.constant 0 : i32
    %2 = arith.cmpi ne, %1, %c0_i32_0 : i32
    scf.if %2 {
      %cst_36 = arith.constant 0.000000e+00 : f32
      %55 = vector.broadcast %cst_36 : f32 to vector<1x4x1xf32>
      %c0_37 = arith.constant 0 : index
      %c0_38 = arith.constant 0 : index
      %c0_39 = arith.constant 0 : index
      %56 = vector.load %arg7[%c0_37, %c0_38, %c0_39] : memref<1x4x1xf32, #tpu.memory_space<vmem>>, vector<1x4x1xf32>
      tpu.vector_store %arg7[%c0_37, %c0_38, %c0_39], %55 {strides = array<i32>} : memref<1x4x1xf32, #tpu.memory_space<vmem>>, vector<1x4x1xf32>,
      %cst_40 = arith.constant 0.000000e+00 : f32
      %57 = vector.broadcast %cst_40 : f32 to vector<1x4x1xf32>
      %c0_41 = arith.constant 0 : index
      %c0_42 = arith.constant 0 : index
      %c0_43 = arith.constant 0 : index
      %58 = vector.load %arg8[%c0_41, %c0_42, %c0_43] : memref<1x4x1xf32, #tpu.memory_space<vmem>>, vector<1x4x1xf32>
      tpu.vector_store %arg8[%c0_41, %c0_42, %c0_43], %57 {strides = array<i32>} : memref<1x4x1xf32, #tpu.memory_space<vmem>>, vector<1x4x1xf32>,
    } else {
    }
    %c0 = arith.constant 0 : index
    %c0_1 = arith.constant 0 : index
    %3 = vector.load %arg3[%c0, %c0_1] : memref<8x16xf32, #tpu.memory_space<vmem>>, vector<8x16xf32>
    %c0_2 = arith.constant 0 : index
    %c0_3 = arith.constant 0 : index
    %4 = vector.load %arg4[%c0_2, %c0_3] : memref<8x1xf32, #tpu.memory_space<vmem>>, vector<8x1xf32>
    %c0_4 = arith.constant 0 : index
    %c0_5 = arith.constant 0 : index
    %5 = vector.load %arg5[%c0_4, %c0_5] : memref<4x8xf32, #tpu.memory_space<vmem>>, vector<4x8xf32>
    %c0_6 = arith.constant 0 : index
    %c0_7 = arith.constant 0 : index
    %6 = vector.load %arg6[%c0_6, %c0_7] : memref<4x1xf32, #tpu.memory_space<vmem>>, vector<4x1xf32>
    %cst = arith.constant 0.000000e+00 : f32
    %7 = vector.broadcast %cst : f32 to vector<4x1xf32>
    %cst_8 = arith.constant 0.000000e+00 : f32
    %8 = vector.broadcast %cst_8 : f32 to vector<4x1xf32>
    %c0_9 = arith.constant 0 : index
    %c0_10 = arith.constant 0 : index
    %c0_11 = arith.constant 0 : index
    %9 = vector.load %arg2[%c0_9, %c0_10, %c0_11] : memref<2x16x256xf32, #tpu.memory_space<vmem>>, vector<1x16x256xf32>
    %10 = vector.shape_cast %9 : vector<1x16x256xf32> to vector<16x256xf32>
    %cst_12 = arith.constant dense<0.000000e+00> : vector<8x256xf32>
    %11 = tpu.matmul %3, %10, %cst_12 {dimension_numbers = #tpu.dot_dimension_numbers<[1], [0], [0], [1], [0, 0, 1, 1], [], []>} : vector<8x16xf32>, vector<16x256xf32>, vector<8x256xf32> -> vector<8x256xf32>
    %12 = vector.broadcast %4 : vector<8x1xf32> to vector<8x256xf32>
    %13 = arith.addf %11, %12 : vector<8x256xf32>
    %cst_13 = arith.constant 0.000000e+00 : f32
    %14 = vector.broadcast %cst_13 : f32 to vector<8x256xf32>
    %15 = arith.maximumf %13, %14 : vector<8x256xf32>
    %cst_14 = arith.constant dense<0.000000e+00> : vector<4x256xf32>
    %16 = tpu.matmul %5, %15, %cst_14 {dimension_numbers = #tpu.dot_dimension_numbers<[1], [0], [0], [1], [0, 0, 1, 1], [], []>} : vector<4x8xf32>, vector<8x256xf32>, vector<4x256xf32> -> vector<4x256xf32>
    %17 = vector.broadcast %6 : vector<4x1xf32> to vector<4x256xf32>
    %18 = arith.addf %16, %17 : vector<4x256xf32>
    %cst_15 = arith.constant dense<0.000000e+00> : vector<4xf32>
    %19 = vector.multi_reduction <add>, %18, %cst_15 [1] : vector<4x256xf32> to vector<4xf32>
    %20 = vector.shape_cast %19 : vector<4xf32> to vector<4x1xf32>
    %21 = arith.addf %7, %20 : vector<4x1xf32>
    %22 = arith.mulf %18, %18 : vector<4x256xf32>
    %cst_16 = arith.constant dense<0.000000e+00> : vector<4xf32>
    %23 = vector.multi_reduction <add>, %22, %cst_16 [1] : vector<4x256xf32> to vector<4xf32>
    %24 = vector.shape_cast %23 : vector<4xf32> to vector<4x1xf32>
    %25 = arith.addf %8, %24 : vector<4x1xf32>
    %c1 = arith.constant 1 : index
    %c0_17 = arith.constant 0 : index
    %c0_18 = arith.constant 0 : index
    %26 = vector.load %arg2[%c1, %c0_17, %c0_18] : memref<2x16x256xf32, #tpu.memory_space<vmem>>, vector<1x16x256xf32>
    %27 = vector.shape_cast %26 : vector<1x16x256xf32> to vector<16x256xf32>
    %cst_19 = arith.constant dense<0.000000e+00> : vector<8x256xf32>
    %28 = tpu.matmul %3, %27, %cst_19 {dimension_numbers = #tpu.dot_dimension_numbers<[1], [0], [0], [1], [0, 0, 1, 1], [], []>} : vector<8x16xf32>, vector<16x256xf32>, vector<8x256xf32> -> vector<8x256xf32>
    %29 = vector.broadcast %4 : vector<8x1xf32> to vector<8x256xf32>
    %30 = arith.addf %28, %29 : vector<8x256xf32>
    %cst_20 = arith.constant 0.000000e+00 : f32
    %31 = vector.broadcast %cst_20 : f32 to vector<8x256xf32>
    %32 = arith.maximumf %30, %31 : vector<8x256xf32>
    %cst_21 = arith.constant dense<0.000000e+00> : vector<4x256xf32>
    %33 = tpu.matmul %5, %32, %cst_21 {dimension_numbers = #tpu.dot_dimension_numbers<[1], [0], [0], [1], [0, 0, 1, 1], [], []>} : vector<4x8xf32>, vector<8x256xf32>, vector<4x256xf32> -> vector<4x256xf32>
    %34 = vector.broadcast %6 : vector<4x1xf32> to vector<4x256xf32>
    %35 = arith.addf %33, %34 : vector<4x256xf32>
    %cst_22 = arith.constant dense<0.000000e+00> : vector<4xf32>
    %36 = vector.multi_reduction <add>, %35, %cst_22 [1] : vector<4x256xf32> to vector<4xf32>
    %37 = vector.shape_cast %36 : vector<4xf32> to vector<4x1xf32>
    %38 = arith.addf %21, %37 : vector<4x1xf32>
    %39 = arith.mulf %35, %35 : vector<4x256xf32>
    %cst_23 = arith.constant dense<0.000000e+00> : vector<4xf32>
    %40 = vector.multi_reduction <add>, %39, %cst_23 [1] : vector<4x256xf32> to vector<4xf32>
    %41 = vector.shape_cast %40 : vector<4xf32> to vector<4x1xf32>
    %42 = arith.addf %25, %41 : vector<4x1xf32>
    %c0_24 = arith.constant 0 : index
    %c0_25 = arith.constant 0 : index
    %c0_26 = arith.constant 0 : index
    %43 = vector.load %arg7[%c0_24, %c0_25, %c0_26] : memref<1x4x1xf32, #tpu.memory_space<vmem>>, vector<1x4x1xf32>
    %44 = vector.shape_cast %43 : vector<1x4x1xf32> to vector<4x1xf32>
    %45 = arith.addf %44, %38 : vector<4x1xf32>
    %c0_27 = arith.constant 0 : index
    %c0_28 = arith.constant 0 : index
    %c0_29 = arith.constant 0 : index
    %46 = vector.load %arg7[%c0_27, %c0_28, %c0_29] : memref<1x4x1xf32, #tpu.memory_space<vmem>>, vector<1x4x1xf32>
    %47 = vector.shape_cast %46 : vector<1x4x1xf32> to vector<4x1xf32>
    %48 = vector.shape_cast %45 : vector<4x1xf32> to vector<1x4x1xf32>
    tpu.vector_store %arg7[%c0_27, %c0_28, %c0_29], %48 {strides = array<i32>} : memref<1x4x1xf32, #tpu.memory_space<vmem>>, vector<1x4x1xf32>,
    %c0_30 = arith.constant 0 : index
    %c0_31 = arith.constant 0 : index
    %c0_32 = arith.constant 0 : index
    %49 = vector.load %arg8[%c0_30, %c0_31, %c0_32] : memref<1x4x1xf32, #tpu.memory_space<vmem>>, vector<1x4x1xf32>
    %50 = vector.shape_cast %49 : vector<1x4x1xf32> to vector<4x1xf32>
    %51 = arith.addf %50, %42 : vector<4x1xf32>
    %c0_33 = arith.constant 0 : index
    %c0_34 = arith.constant 0 : index
    %c0_35 = arith.constant 0 : index
    %52 = vector.load %arg8[%c0_33, %c0_34, %c0_35] : memref<1x4x1xf32, #tpu.memory_space<vmem>>, vector<1x4x1xf32>
    %53 = vector.shape_cast %52 : vector<1x4x1xf32> to vector<4x1xf32>
    %54 = vector.shape_cast %51 : vector<4x1xf32> to vector<1x4x1xf32>
    tpu.vector_store %arg8[%c0_33, %c0_34, %c0_35], %54 {strides = array<i32>} : memref<1x4x1xf32, #tpu.memory_space<vmem>>, vector<1x4x1xf32>,
    return
  }
  func.func @transform_0(%arg0: i32, %arg1: i32) -> (i32, i32, i32) {
    %c0_i32 = arith.constant 0 : i32
    %c0_i32_0 = arith.constant 0 : i32
    return %arg0, %c0_i32, %arg1 : i32, i32, i32
  }
  func.func @transform_1(%arg0: i32, %arg1: i32) -> (i32, i32) {
    %c0_i32 = arith.constant 0 : i32
    %c0_i32_0 = arith.constant 0 : i32
    %c0_i32_1 = arith.constant 0 : i32
    return %c0_i32, %c0_i32_0 : i32, i32
  }
  func.func @transform_2(%arg0: i32, %arg1: i32) -> (i32, i32) {
    %c0_i32 = arith.constant 0 : i32
    %c0_i32_0 = arith.constant 0 : i32
    %c0_i32_1 = arith.constant 0 : i32
    return %c0_i32, %c0_i32_0 : i32, i32
  }
  func.func @transform_3(%arg0: i32, %arg1: i32) -> (i32, i32) {
    %c0_i32 = arith.constant 0 : i32
    %c0_i32_0 = arith.constant 0 : i32
    %c0_i32_1 = arith.constant 0 : i32
    return %c0_i32, %c0_i32_0 : i32, i32
  }
  func.func @transform_4(%arg0: i32, %arg1: i32) -> (i32, i32) {
    %c0_i32 = arith.constant 0 : i32
    %c0_i32_0 = arith.constant 0 : i32
    %c0_i32_1 = arith.constant 0 : i32
    return %c0_i32, %c0_i32_0 : i32, i32
  }
  func.func @transform_5(%arg0: i32, %arg1: i32) -> (i32, i32, i32) {
    %c0_i32 = arith.constant 0 : i32
    %c0_i32_0 = arith.constant 0 : i32
    %c0_i32_1 = arith.constant 0 : i32
    return %arg0, %c0_i32, %c0_i32_0 : i32, i32, i32
  }
  func.func @transform_6(%arg0: i32, %arg1: i32) -> (i32, i32, i32) {
    %c0_i32 = arith.constant 0 : i32
    %c0_i32_0 = arith.constant 0 : i32
    %c0_i32_1 = arith.constant 0 : i32
    return %arg0, %c0_i32, %c0_i32_0 : i32, i32, i32
  }
}

module attributes {stable_mosaic.version = 11 : i64} {
  func.func @_final_kernel(%arg0: i32, %arg1: i32, %arg2: memref<2x16x256xf32, #tpu.memory_space<vmem>>, %arg3: memref<8x16xf32, #tpu.memory_space<vmem>>, %arg4: memref<8x1xf32, #tpu.memory_space<vmem>>, %arg5: memref<4x8xf32, #tpu.memory_space<vmem>>, %arg6: memref<4x1xf32, #tpu.memory_space<vmem>>, %arg7: memref<4x1xf32, #tpu.memory_space<vmem>>, %arg8: memref<1x1xf32, #tpu.memory_space<vmem>>, %arg9: memref<2x1x256xf32, #tpu.memory_space<vmem>>) attributes {dimension_semantics = [#tpu.dimension_semantics<parallel>, #tpu.dimension_semantics<parallel>], iteration_bounds = array<i64: 1, 1>, scalar_prefetch = 0 : i64, scratch_operands = 0 : i64, tpu.core_type = #tpu.core_type<tc>, window_params = [{transform_indices = @transform_0, window_bounds = array<i64: 2, 16, 256>}, {pipeline_mode = #tpu.pipeline_mode<synchronous>, transform_indices = @transform_1, window_bounds = array<i64: 8, 16>}, {pipeline_mode = #tpu.pipeline_mode<synchronous>, transform_indices = @transform_2, window_bounds = array<i64: 8, 1>}, {pipeline_mode = #tpu.pipeline_mode<synchronous>, transform_indices = @transform_3, window_bounds = array<i64: 4, 8>}, {pipeline_mode = #tpu.pipeline_mode<synchronous>, transform_indices = @transform_4, window_bounds = array<i64: 4, 1>}, {pipeline_mode = #tpu.pipeline_mode<synchronous>, transform_indices = @transform_5, window_bounds = array<i64: 4, 1>}, {pipeline_mode = #tpu.pipeline_mode<synchronous>, transform_indices = @transform_6, window_bounds = array<i64: 1, 1>}, {transform_indices = @transform_7, window_bounds = array<i64: 2, 1, 256>}]} {
    %c0 = arith.constant 0 : index
    %c0_0 = arith.constant 0 : index
    %0 = vector.load %arg3[%c0, %c0_0] : memref<8x16xf32, #tpu.memory_space<vmem>>, vector<8x16xf32>
    %c0_1 = arith.constant 0 : index
    %c0_2 = arith.constant 0 : index
    %1 = vector.load %arg4[%c0_1, %c0_2] : memref<8x1xf32, #tpu.memory_space<vmem>>, vector<8x1xf32>
    %c0_3 = arith.constant 0 : index
    %c0_4 = arith.constant 0 : index
    %2 = vector.load %arg5[%c0_3, %c0_4] : memref<4x8xf32, #tpu.memory_space<vmem>>, vector<4x8xf32>
    %c0_5 = arith.constant 0 : index
    %c0_6 = arith.constant 0 : index
    %3 = vector.load %arg6[%c0_5, %c0_6] : memref<4x1xf32, #tpu.memory_space<vmem>>, vector<4x1xf32>
    %c0_7 = arith.constant 0 : index
    %c0_8 = arith.constant 0 : index
    %4 = vector.load %arg7[%c0_7, %c0_8] : memref<4x1xf32, #tpu.memory_space<vmem>>, vector<4x1xf32>
    %c0_9 = arith.constant 0 : index
    %c0_10 = arith.constant 0 : index
    %5 = vector.load %arg8[%c0_9, %c0_10] : memref<1x1xf32, #tpu.memory_space<vmem>>, vector<1x1xf32>
    %c0_11 = arith.constant 0 : index
    %c0_12 = arith.constant 0 : index
    %c0_13 = arith.constant 0 : index
    %6 = vector.load %arg2[%c0_11, %c0_12, %c0_13] : memref<2x16x256xf32, #tpu.memory_space<vmem>>, vector<1x16x256xf32>
    %7 = vector.shape_cast %6 : vector<1x16x256xf32> to vector<16x256xf32>
    %cst = arith.constant dense<0.000000e+00> : vector<8x256xf32>
    %8 = tpu.matmul %0, %7, %cst {dimension_numbers = #tpu.dot_dimension_numbers<[1], [0], [0], [1], [0, 0, 1, 1], [], []>} : vector<8x16xf32>, vector<16x256xf32>, vector<8x256xf32> -> vector<8x256xf32>
    %9 = vector.broadcast %1 : vector<8x1xf32> to vector<8x256xf32>
    %10 = arith.addf %8, %9 : vector<8x256xf32>
    %cst_14 = arith.constant 0.000000e+00 : f32
    %11 = vector.broadcast %cst_14 : f32 to vector<8x256xf32>
    %12 = arith.maximumf %10, %11 : vector<8x256xf32>
    %cst_15 = arith.constant dense<0.000000e+00> : vector<4x256xf32>
    %13 = tpu.matmul %2, %12, %cst_15 {dimension_numbers = #tpu.dot_dimension_numbers<[1], [0], [0], [1], [0, 0, 1, 1], [], []>} : vector<4x8xf32>, vector<8x256xf32>, vector<4x256xf32> -> vector<4x256xf32>
    %14 = vector.broadcast %3 : vector<4x1xf32> to vector<4x256xf32>
    %15 = arith.addf %13, %14 : vector<4x256xf32>
    %cst_16 = arith.constant 0.000000e+00 : f32
    %16 = vector.broadcast %cst_16 : f32 to vector<4x256xf32>
    %17 = arith.maximumf %15, %16 : vector<4x256xf32>
    %18 = vector.broadcast %4 : vector<4x1xf32> to vector<4x256xf32>
    %19 = arith.mulf %17, %18 : vector<4x256xf32>
    %cst_17 = arith.constant dense<0.000000e+00> : vector<256xf32>
    %20 = vector.multi_reduction <add>, %19, %cst_17 [0] : vector<4x256xf32> to vector<256xf32>
    %21 = vector.shape_cast %20 : vector<256xf32> to vector<1x256xf32>
    %22 = vector.broadcast %5 : vector<1x1xf32> to vector<1x256xf32>
    %23 = arith.addf %21, %22 : vector<1x256xf32>
    %cst_18 = arith.constant 0.000000e+00 : f32
    %24 = vector.broadcast %cst_18 : f32 to vector<1x256xf32>
    %25 = arith.subf %24, %23 : vector<1x256xf32>
    %26 = math.exp %25 : vector<1x256xf32>
    %cst_19 = arith.constant 1.000000e+00 : f32
    %27 = vector.broadcast %cst_19 : f32 to vector<1x256xf32>
    %28 = arith.addf %27, %26 : vector<1x256xf32>
    %cst_20 = arith.constant 1.000000e+00 : f32
    %29 = vector.broadcast %cst_20 : f32 to vector<1x256xf32>
    %30 = arith.divf %29, %28 : vector<1x256xf32>
    %c0_21 = arith.constant 0 : index
    %c0_22 = arith.constant 0 : index
    %c0_23 = arith.constant 0 : index
    %31 = vector.load %arg9[%c0_21, %c0_22, %c0_23] : memref<2x1x256xf32, #tpu.memory_space<vmem>>, vector<1x1x256xf32>
    %32 = vector.shape_cast %31 : vector<1x1x256xf32> to vector<1x256xf32>
    %33 = vector.shape_cast %30 : vector<1x256xf32> to vector<1x1x256xf32>
    tpu.vector_store %arg9[%c0_21, %c0_22, %c0_23], %33 {strides = array<i32>} : memref<2x1x256xf32, #tpu.memory_space<vmem>>, vector<1x1x256xf32>,
    %c1 = arith.constant 1 : index
    %c0_24 = arith.constant 0 : index
    %c0_25 = arith.constant 0 : index
    %34 = vector.load %arg2[%c1, %c0_24, %c0_25] : memref<2x16x256xf32, #tpu.memory_space<vmem>>, vector<1x16x256xf32>
    %35 = vector.shape_cast %34 : vector<1x16x256xf32> to vector<16x256xf32>
    %cst_26 = arith.constant dense<0.000000e+00> : vector<8x256xf32>
    %36 = tpu.matmul %0, %35, %cst_26 {dimension_numbers = #tpu.dot_dimension_numbers<[1], [0], [0], [1], [0, 0, 1, 1], [], []>} : vector<8x16xf32>, vector<16x256xf32>, vector<8x256xf32> -> vector<8x256xf32>
    %37 = vector.broadcast %1 : vector<8x1xf32> to vector<8x256xf32>
    %38 = arith.addf %36, %37 : vector<8x256xf32>
    %cst_27 = arith.constant 0.000000e+00 : f32
    %39 = vector.broadcast %cst_27 : f32 to vector<8x256xf32>
    %40 = arith.maximumf %38, %39 : vector<8x256xf32>
    %cst_28 = arith.constant dense<0.000000e+00> : vector<4x256xf32>
    %41 = tpu.matmul %2, %40, %cst_28 {dimension_numbers = #tpu.dot_dimension_numbers<[1], [0], [0], [1], [0, 0, 1, 1], [], []>} : vector<4x8xf32>, vector<8x256xf32>, vector<4x256xf32> -> vector<4x256xf32>
    %42 = vector.broadcast %3 : vector<4x1xf32> to vector<4x256xf32>
    %43 = arith.addf %41, %42 : vector<4x256xf32>
    %cst_29 = arith.constant 0.000000e+00 : f32
    %44 = vector.broadcast %cst_29 : f32 to vector<4x256xf32>
    %45 = arith.maximumf %43, %44 : vector<4x256xf32>
    %46 = vector.broadcast %4 : vector<4x1xf32> to vector<4x256xf32>
    %47 = arith.mulf %45, %46 : vector<4x256xf32>
    %cst_30 = arith.constant dense<0.000000e+00> : vector<256xf32>
    %48 = vector.multi_reduction <add>, %47, %cst_30 [0] : vector<4x256xf32> to vector<256xf32>
    %49 = vector.shape_cast %48 : vector<256xf32> to vector<1x256xf32>
    %50 = vector.broadcast %5 : vector<1x1xf32> to vector<1x256xf32>
    %51 = arith.addf %49, %50 : vector<1x256xf32>
    %cst_31 = arith.constant 0.000000e+00 : f32
    %52 = vector.broadcast %cst_31 : f32 to vector<1x256xf32>
    %53 = arith.subf %52, %51 : vector<1x256xf32>
    %54 = math.exp %53 : vector<1x256xf32>
    %cst_32 = arith.constant 1.000000e+00 : f32
    %55 = vector.broadcast %cst_32 : f32 to vector<1x256xf32>
    %56 = arith.addf %55, %54 : vector<1x256xf32>
    %cst_33 = arith.constant 1.000000e+00 : f32
    %57 = vector.broadcast %cst_33 : f32 to vector<1x256xf32>
    %58 = arith.divf %57, %56 : vector<1x256xf32>
    %c1_34 = arith.constant 1 : index
    %c0_35 = arith.constant 0 : index
    %c0_36 = arith.constant 0 : index
    %59 = vector.load %arg9[%c1_34, %c0_35, %c0_36] : memref<2x1x256xf32, #tpu.memory_space<vmem>>, vector<1x1x256xf32>
    %60 = vector.shape_cast %59 : vector<1x1x256xf32> to vector<1x256xf32>
    %61 = vector.shape_cast %58 : vector<1x256xf32> to vector<1x1x256xf32>
    tpu.vector_store %arg9[%c1_34, %c0_35, %c0_36], %61 {strides = array<i32>} : memref<2x1x256xf32, #tpu.memory_space<vmem>>, vector<1x1x256xf32>,
    return
  }
  func.func @transform_0(%arg0: i32, %arg1: i32) -> (i32, i32, i32) {
    %c0_i32 = arith.constant 0 : i32
    %c0_i32_0 = arith.constant 0 : i32
    return %arg0, %c0_i32, %arg1 : i32, i32, i32
  }
  func.func @transform_1(%arg0: i32, %arg1: i32) -> (i32, i32) {
    %c0_i32 = arith.constant 0 : i32
    %c0_i32_0 = arith.constant 0 : i32
    %c0_i32_1 = arith.constant 0 : i32
    return %c0_i32, %c0_i32_0 : i32, i32
  }
  func.func @transform_2(%arg0: i32, %arg1: i32) -> (i32, i32) {
    %c0_i32 = arith.constant 0 : i32
    %c0_i32_0 = arith.constant 0 : i32
    %c0_i32_1 = arith.constant 0 : i32
    return %c0_i32, %c0_i32_0 : i32, i32
  }
  func.func @transform_3(%arg0: i32, %arg1: i32) -> (i32, i32) {
    %c0_i32 = arith.constant 0 : i32
    %c0_i32_0 = arith.constant 0 : i32
    %c0_i32_1 = arith.constant 0 : i32
    return %c0_i32, %c0_i32_0 : i32, i32
  }
  func.func @transform_4(%arg0: i32, %arg1: i32) -> (i32, i32) {
    %c0_i32 = arith.constant 0 : i32
    %c0_i32_0 = arith.constant 0 : i32
    %c0_i32_1 = arith.constant 0 : i32
    return %c0_i32, %c0_i32_0 : i32, i32
  }
  func.func @transform_5(%arg0: i32, %arg1: i32) -> (i32, i32) {
    %c0_i32 = arith.constant 0 : i32
    %c0_i32_0 = arith.constant 0 : i32
    %c0_i32_1 = arith.constant 0 : i32
    return %c0_i32, %c0_i32_0 : i32, i32
  }
  func.func @transform_6(%arg0: i32, %arg1: i32) -> (i32, i32) {
    %c0_i32 = arith.constant 0 : i32
    %c0_i32_0 = arith.constant 0 : i32
    %c0_i32_1 = arith.constant 0 : i32
    return %c0_i32, %c0_i32_0 : i32, i32
  }
  func.func @transform_7(%arg0: i32, %arg1: i32) -> (i32, i32, i32) {
    %c0_i32 = arith.constant 0 : i32
    %c0_i32_0 = arith.constant 0 : i32
    return %arg0, %c0_i32, %arg1 : i32, i32, i32
  }
}

</mosaic_0001>

<bundles_post_ra>
// kernel: improved_discriminator_forward.3
= control target key start
LH: loop header
LB: loop body
LE: loop exit
PB: predicated region body
PF: predicated region fallthrough
CT: control target
= control target key end

     0   :  { %v237_v3 = vmov 0.0   ;;  %v238_v8 = vmov 0   ;;  %vm34_vm0 = vcmask 130048   ;;  %vm20_vm1 = vcmask 7168   ;;  %s316_s0 = inlined_call_operand.vmem [shape: f32[2,16,256], index: 0, kind: input, shape index: {}]   ;;  %s317_s2 = inlined_call_operand.vmem [shape: f32[8,1], index: 2, kind: input, shape index: {}]   ;;  %s318_s1 = inlined_call_operand.vmem [shape: f32[8,16], index: 1, kind: input, shape index: {}]   ;;  %s319_s3 = inlined_call_operand.vmem [shape: f32[1,8,1], index: 3, kind: output, shape index: {0}]   ;;  %s320_s4 = inlined_call_operand.vmem [shape: f32[1,8,1], index: 4, kind: output, shape index: {1}]  }
   0x1   :  { %v26_v0 = vld [vmem:[%s316_s0 + $0x8] sm:$0xff]  ;;  %v28_v1 = vld [vmem:[%s316_s0 + $0x18] sm:$0xff]  ;;  %102 = vmatprep.mubr.f32.mxu0 %v237_v3  ;;  %188 = vmatprep.mubr.f32.mxu1 %v237_v3  ;;  %v25_v6 = vld [vmem:[%s316_s0] sm:$0xff]  ;;  %21 = vst.msk [vmem:[%s319_s3] sm:$0xff] %vm20_vm1, %v237_v3 }
   0x2   :  { %v222_v2 = vld [vmem:[%s316_s0 + $0x28] sm:$0xff]  ;;  %v226_v4 = vpack.c.bf16 %v28_v1, %v26_v0  ;;  %v224_v5 = vld [vmem:[%s316_s0 + $0x38] sm:$0xff]  ;;  %v27_v7 = vld [vmem:[%s316_s0 + $0x10] sm:$0xff]  ;;  %236 = vset.pattern.permute.xlu0 %v238_v8  ;;  %22 = vst.msk [vmem:[%s320_s4] sm:$0xff] %vm20_vm1, %v237_v3 }
   0x3   :  { %v230_v9 = vpack.c.bf16 %v224_v5, %v222_v2  ;;  %v228_v10 = vpack.c.bf16 %v27_v7, %v25_v6  ;;  %v221_v11 = vld [vmem:[%s316_s0 + $0x20] sm:$0xff]  ;;  %v223_v12 = vld [vmem:[%s316_s0 + $0x30] sm:$0xff] }
   0x4   :  { %227 = vmatprep.subr.bf16.mxu0 %v226_v4  ;;  %v232_v13 = vpack.c.bf16 %v223_v12, %v221_v11  ;;  %v24_v14 = vld [vmem:[%s317_s2] sm:$0xff] }
   0x5   :  { %231 = vmatprep.subr.bf16.mxu1 %v230_v9  ;;  %229 = vmatpush1.bf16.msra.mxu0 %v228_v10  ;;  %v23_v15 = vld [vmem:[%s318_s1] sm:$0xff] }
   0x6   :  { %233 = vmatpush1.bf16.msra.mxu1 %v232_v13  ;;  %31 = vperm.xlu0 %236, %v24_v14  }
   0x8   :  { %220 = vmatmul.mubr.msk.f32.vlgmr.msra.gmra.mrb[0].mxu0 %vm34_vm0, %v23_v15  ;;  %v205_v35 = vld [vmem:[%s319_s3] sm:$0xff] }
   0x9   :  { %225 = vmatmul.mubr.msk.f32.vlgmr.msra.gmra.mrb[0].mxu1 %vm34_vm0, %v23_v15  ;;  %v209_v39 = vld [vmem:[%s320_s4] sm:$0xff] }
  0x85   :  { %v32_v16 = vpop.permute.xlu0 %31 }
  0xdb   :  { %v104_v17 = vpop.f32.mrb[0].mxu0 }
  0xdc   :  { %v105_v18 = vadd.f32 %v104_v17, %v32_v16  ;;  %v190_v19 = vpop.f32.mrb[0].mxu1  ;;  %v106_v20 = vpop.f32.mrb[1].mxu0 }
  0xdd   :  { %v191_v21 = vadd.f32 %v190_v19, %v32_v16  ;;  %v107_v22 = vadd.f32 %v106_v20, %v32_v16  ;;  %v192_v23 = vpop.f32.mrb[1].mxu1 }
  0xde   :  { %v113_v24 = vmul.f32 %v105_v18, %v105_v18  ;;  %v193_v25 = vadd.f32 %v192_v23, %v32_v16 }
  0xdf   :  { %v199_v26 = vmul.f32 %v191_v21, %v191_v21  ;;  %v114_v27 = vmul.f32 %v107_v22, %v107_v22  ;;  %v109_v28 = vadd.f32 %v107_v22, %v105_v18 }
  0xe0   :  { %v200_v29 = vmul.f32 %v193_v25, %v193_v25  ;;  %v195_v30 = vadd.f32 %v193_v25, %v191_v21 }
  0xe1   :  { %110 = vadd.xlane.f32.xlu0 %v109_v28  ;;  %v115_v31 = vadd.f32 %v114_v27, %v113_v24 }
  0xe2   :  { %196 = vadd.xlane.f32.xlu1 %v195_v30  ;;  %v201_v32 = vadd.f32 %v200_v29, %v199_v26 }
  0xe6   :  { %116 = vadd.xlane.f32.xlu1 %v115_v31 }
  0xea   :  { %202 = vadd.xlane.f32.xlu1 %v201_v32 }
 0x16e   :  { %v111_v33 = vpop.xlane.xlu0 %110 }
 0x16f   :  { %v197_v34 = vpop.xlane.xlu1 %196 }
 0x170   :  { %v198_v36 = vadd.f32 %v197_v34, %v111_v33 }
 0x172   :  { %v206_v37 = vadd.f32 %v205_v35, %v198_v36 }
 0x173   :  { %v117_v38 = vpop.xlane.xlu1 %116 }
 0x174   :  { %208 = vst.msk [vmem:[%s319_s3] sm:$0xff] %vm20_vm1, %v206_v37 }
 0x177   :  { %v203_v40 = vpop.xlane.xlu1 %202 }
 0x178   :  { %v204_v41 = vadd.f32 %v203_v40, %v117_v38 }
 0x17a   :  { %v210_v42 = vadd.f32 %v209_v39, %v204_v41 }
 0x17c   :  { %211 = vst.msk [vmem:[%s320_s4] sm:$0xff] %vm20_vm1, %v210_v42 }

// kernel: improved_discriminator_forward.4
= control target key start
LH: loop header
LB: loop body
LE: loop exit
PB: predicated region body
PF: predicated region fallthrough
CT: control target
= control target key end

     0   :  { %v411_v3 = vmov 0.0   ;;  %v412_v4 = vmov 0   ;;  %vm42_vm0 = vcmask 130048   ;;  %vm124_vm1 = vcmask 64512   ;;  %s524_s0 = inlined_call_operand.vmem [shape: f32[2,16,256], index: 0, kind: input, shape index: {}]   ;;  %s525_s2 = inlined_call_operand.vmem [shape: f32[8,1], index: 2, kind: input, shape index: {}]   ;;  %s526_s4 = inlined_call_operand.vmem [shape: f32[4,1], index: 4, kind: input, shape index: {}]   ;;  %s527_s1 = inlined_call_operand.vmem [shape: f32[8,16], index: 1, kind: input, shape index: {}]   ;;  %s528_s3 = inlined_call_operand.vmem [shape: f32[4,8], index: 3, kind: input, shape index: {}]   ;;  %s529_s5 = inlined_call_operand.vmem [shape: f32[1,4,1], index: 5, kind: output, shape index: {0}]   ;;  %s530_s6 = inlined_call_operand.vmem [shape: f32[1,4,1], index: 6, kind: output, shape index: {1}]  }
   0x1   :  { %v34_v0 = vld [vmem:[%s524_s0 + $0x8] sm:$0xff]  ;;  %v36_v1 = vld [vmem:[%s524_s0 + $0x18] sm:$0xff]  ;;  %v33_v2 = vld [vmem:[%s524_s0] sm:$0xff]  ;;  %110 = vmatprep.mubr.f32.mxu0 %v411_v3  ;;  %410 = vset.pattern.permute.xlu0 %v412_v4  ;;  %vm199_vm2 = vcmask 1043456   ;;  %vm26_vm3 = vcmask 3072  }
   0x2   :  { %v400_v5 = vpack.c.bf16 %v36_v1, %v34_v0  ;;  %v35_v6 = vld [vmem:[%s524_s0 + $0x10] sm:$0xff]  ;;  %v30_v7 = vld [vmem:[%s525_s2] sm:$0xff]  ;;  %192 = vmatprep.mubr.f32.mxu1 %v411_v3  ;;  %v395_v15 = vld [vmem:[%s524_s0 + $0x28] sm:$0xff]  ;;  %27 = vst.msk [vmem:[%s529_s5] sm:$0xf] %vm26_vm3, %v411_v3 }
   0x3   :  { %v402_v8 = vpack.c.bf16 %v35_v6, %v33_v2  ;;  %39 = vperm.xlu0 %410, %v30_v7   ;;  %v32_v9 = vld [vmem:[%s526_s4] sm:$0xf]  ;;  %v397_v16 = vld [vmem:[%s524_s0 + $0x38] sm:$0xff]  ;;  %v396_v19 = vld [vmem:[%s524_s0 + $0x30] sm:$0xff]  ;;  %28 = vst.msk [vmem:[%s530_s6] sm:$0xf] %vm26_vm3, %v411_v3 }
   0x4   :  { %401 = vmatprep.subr.bf16.mxu0 %v400_v5  ;;  %v29_v10 = vld [vmem:[%s527_s1] sm:$0xff]  ;;  %v404_v21 = vpack.c.bf16 %v397_v16, %v395_v15 }
   0x5   :  { %403 = vmatpush1.bf16.msra.mxu0 %v402_v8  ;;  %v394_v18 = vld [vmem:[%s524_s0 + $0x20] sm:$0xff] }
   0x6   :  { %v31_v23 = vld [vmem:[%s528_s3] sm:$0xf]  ;;  %v406_v24 = vpack.c.bf16 %v396_v19, %v394_v18 }
   0x7   :  { %121 = vperm.xlu0 %410, %v32_v9  }
   0x8   :  { %392 = vmatmul.mubr.msk.f32.vlgmr.msra.gmra.mrb[0].mxu0 %vm42_vm0, %v29_v10 }
   0x9   :  { %356 = vmatprep.mubr.f32.mxu0 %v411_v3  ;;  %v377_v58 = vld [vmem:[%s529_s5] sm:$0xf] }
   0xa   :  { %v381_v61 = vld [vmem:[%s530_s6] sm:$0xf] }
  0x82   :  { %v40_v11 = vpop.permute.xlu0 %39 }
  0x86   :  { %v122_v25 = vpop.permute.xlu0 %121 }
  0xdb   :  { %v112_v12 = vpop.f32.mrb[0].mxu0 }
  0xdc   :  { %v113_v13 = vadd.f32 %v112_v12, %v40_v11  ;;  %v114_v14 = vpop.f32.mrb[1].mxu0 }
  0xdd   :  { %v115_v17 = vadd.f32 %v114_v14, %v40_v11 }
  0xde   :  { %v117_v22 = vmax.f32 %v113_v13, 0.0 }
  0xdf   :  { %v118_v20 = vmax.f32 %v115_v17, 0.0 }
  0xe1   :  { %128 = vmatprep.subr.mxu1 %v118_v20 }
  0xe2   :  { %129 = vmatpush1.msra.mxu1 %v117_v22 }
  0xe3   :  { %393 = vmatmul.mubr.msk.f32.vlgmr.msra.gmra.mrb[0].mxu1 %vm124_vm1, %v31_v23  ;;  %405 = vmatprep.subr.bf16.mxu1 %v404_v21 }
  0xe4   :  { %407 = vmatpush1.bf16.msra.mxu1 %v406_v24  ;;  %283 = vmatprep.mubr.f32.mxu1 %v411_v3 }
  0xe7   :  { %398 = vmatmul.mubr.msk.f32.vlgmr.msra.gmra.mrb[2].mxu1 %vm42_vm0, %v29_v10 }
 0x1b6   :  { %v194_v26 = vpop.f32.mrb[0].mxu1 }
 0x1b7   :  { %v195_v27 = vadd.f32 %v194_v26, %v122_v25  ;;  %v196_v28 = vpop.f32.mrb[1].mxu1 }
 0x1b8   :  { %v197_v29 = vadd.f32 %v196_v28, %v122_v25 }
 0x1b9   :  { %v206_v30 = vmul.f32 %v195_v27, %v195_v27  ;;  %v200_v31 = vsel %vm199_vm2, %v195_v27, 0.0 }
 0x1ba   :  { %v207_v32 = vmul.f32 %v197_v29, %v197_v29  ;;  %v285_v33 = vpop.f32.mrb[2].mxu1  ;;  %v201_v34 = vsel %vm199_vm2, %v197_v29, 0.0 }
 0x1bb   :  { %v286_v35 = vadd.f32 %v285_v33, %v40_v11  ;;  %v287_v36 = vpop.f32.mrb[3].mxu1  ;;  %v202_v37 = vadd.f32 %v201_v34, %v200_v31  ;;  %v208_v38 = vsel %vm199_vm2, %v206_v30, 0.0 }
 0x1bc   :  { %v288_v39 = vadd.f32 %v287_v36, %v40_v11  ;;  %v209_v40 = vsel %vm199_vm2, %v207_v32, 0.0 }
 0x1bd   :  { %203 = vadd.xlane.f32.xlu1 %v202_v37  ;;  %v210_v41 = vadd.f32 %v209_v40, %v208_v38  ;;  %v290_v43 = vmax.f32 %v286_v35, 0.0 }
 0x1be   :  { %v291_v42 = vmax.f32 %v288_v39, 0.0 }
 0x1c0   :  { %292 = vmatprep.subr.mxu0 %v291_v42 }
 0x1c1   :  { %293 = vmatpush1.msra.mxu0 %v290_v43  ;;  %211 = vadd.xlane.f32.xlu1 %v210_v41 }
 0x1c2   :  { %399 = vmatmul.mubr.msk.f32.vlgmr.msra.gmra.mrb[2].mxu0 %vm124_vm1, %v31_v23 }
 0x24a   :  { %v204_v56 = vpop.xlane.xlu1 %203 }
 0x24e   :  { %v212_v57 = vpop.xlane.xlu1 %211 }
 0x295   :  { %v358_v44 = vpop.f32.mrb[2].mxu0 }
 0x296   :  { %v359_v45 = vadd.f32 %v358_v44, %v122_v25  ;;  %v360_v46 = vpop.f32.mrb[3].mxu0 }
 0x297   :  { %v361_v47 = vadd.f32 %v360_v46, %v122_v25 }
 0x298   :  { %v369_v48 = vmul.f32 %v359_v45, %v359_v45  ;;  %v363_v49 = vsel %vm199_vm2, %v359_v45, 0.0 }
 0x299   :  { %v370_v50 = vmul.f32 %v361_v47, %v361_v47  ;;  %v364_v51 = vsel %vm199_vm2, %v361_v47, 0.0 }
 0x29a   :  { %v365_v52 = vadd.f32 %v364_v51, %v363_v49  ;;  %v371_v53 = vsel %vm199_vm2, %v369_v48, 0.0 }
 0x29b   :  { %v372_v54 = vsel %vm199_vm2, %v370_v50, 0.0 }
 0x29c   :  { %366 = vadd.xlane.f32.xlu0 %v365_v52  ;;  %v373_v55 = vadd.f32 %v372_v54, %v371_v53 }
 0x29e   :  { %374 = vadd.xlane.f32.xlu1 %v373_v55 }
 0x329   :  { %v367_v59 = vpop.xlane.xlu0 %366 }
 0x32a   :  { %v368_v60 = vadd.f32 %v367_v59, %v204_v56 }
 0x32b   :  { %v375_v62 = vpop.xlane.xlu1 %374 }
 0x32c   :  { %v378_v63 = vadd.f32 %v377_v58, %v368_v60  ;;  %v376_v0 = vadd.f32 %v375_v62, %v212_v57 }
 0x32e   :  { %380 = vst.msk [vmem:[%s529_s5] sm:$0xf] %vm26_vm3, %v378_v63  ;;  %v382_v1 = vadd.f32 %v381_v61, %v376_v0 }
 0x330   :  { %383 = vst.msk [vmem:[%s530_s6] sm:$0xf] %vm26_vm3, %v382_v1 }

// kernel: improved_discriminator_forward.5
= control target key start
LH: loop header
LB: loop body
LE: loop exit
PB: predicated region body
PF: predicated region fallthrough
CT: control target
= control target key end

     0   :  { %v513_v3 = vmov 0.0   ;;  %v514_v4 = vmov 0   ;;  %vm43_vm0 = vcmask 130048   ;;  %vm125_vm1 = vcmask 64512   ;;  %s632_s0 = inlined_call_operand.vmem [shape: f32[2,16,256], index: 0, kind: input, shape index: {}]   ;;  %s633_s2 = inlined_call_operand.vmem [shape: f32[8,1], index: 2, kind: input, shape index: {}]   ;;  %s634_s4 = inlined_call_operand.vmem [shape: f32[4,1], index: 4, kind: input, shape index: {}]   ;;  %s635_s1 = inlined_call_operand.vmem [shape: f32[8,16], index: 1, kind: input, shape index: {}]   ;;  %s636_s5 = inlined_call_operand.vmem [shape: f32[4,1], index: 5, kind: input, shape index: {}]   ;;  %s637_s6 = inlined_call_operand.<no memory space> [shape: f32[1,1], index: 6, kind: input, shape index: {}]   ;;  %s638_s3 = inlined_call_operand.vmem [shape: f32[4,8], index: 3, kind: input, shape index: {}]   ;;  %s639_s7 = inlined_call_operand.vmem [shape: f32[2,1,256], index: 7, kind: output, shape index: {}]  }
   0x1   :  { %v35_v0 = vld [vmem:[%s632_s0 + $0x8] sm:$0xff]  ;;  %v37_v1 = vld [vmem:[%s632_s0 + $0x18] sm:$0xff]  ;;  %v34_v2 = vld [vmem:[%s632_s0] sm:$0xff]  ;;  %111 = vmatprep.mubr.f32.mxu0 %v513_v3  ;;  %495 = vset.pattern.permute.xlu0 %v514_v4  ;;  %v12_v12 = vstv %s637_s6  ;;  %vm209_vm2 = vcmask 1043456   ;;  %v229_v37 = vlaneseq }
   0x2   :  { %v484_v5 = vpack.c.bf16 %v37_v1, %v35_v0  ;;  %v36_v6 = vld [vmem:[%s632_s0 + $0x10] sm:$0xff]  ;;  %v29_v7 = vld [vmem:[%s633_s2] sm:$0xff]  ;;  %193 = vmatprep.mubr.f32.mxu1 %v513_v3  ;;  %496 = vset.pattern.permute.xlu1 %v514_v4  ;;  %13 = vst [vmem:[#allocation2] sm:$0x1] %v12_v12  ;;  %v478_v18 = vld [vmem:[%s632_s0 + $0x28] sm:$0xff] }
   0x3   :  { %v486_v8 = vpack.c.bf16 %v36_v6, %v34_v2  ;;  %40 = vperm.xlu0 %495, %v29_v7   ;;  %v31_v9 = vld [vmem:[%s634_s4] sm:$0xf]  ;;  %v480_v19 = vld [vmem:[%s632_s0 + $0x38] sm:$0xff]  ;;  %v479_v22 = vld [vmem:[%s632_s0 + $0x30] sm:$0xff]  ;;  %v230_v47 = vshrl.u32 %v229_v37, 7  ;;  %vm612_vm3 = vcmp.lt.s32.totalorder %v229_v37, 256 }
   0x4   :  { %485 = vmatprep.subr.bf16.mxu0 %v484_v5  ;;  %v28_v10 = vld [vmem:[%s635_s1] sm:$0xff]  ;;  %v488_v24 = vpack.c.bf16 %v480_v19, %v478_v18 }
   0x5   :  { %487 = vmatpush1.bf16.msra.mxu0 %v486_v8  ;;  %v32_v11 = vld [vmem:[%s636_s5] sm:$0xf]  ;;  %v231_v53 = vsub.s32 0, %v230_v47 }
   0x6   :  { %204 = vperm.xlu1 %496, %v32_v11   ;;  %v477_v21 = vld [vmem:[%s632_s0 + $0x20] sm:$0xff] }
   0x7   :  { %122 = vperm.xlu0 %495, %v31_v9   ;;  %v30_v26 = vld [vmem:[%s638_s3] sm:$0xf]  ;;  %v490_v27 = vpack.c.bf16 %v479_v22, %v477_v21  ;;  %v515_v9 = vmov 1966171168  }
   0x8   :  { %475 = vmatmul.mubr.msk.f32.vlgmr.msra.gmra.mrb[0].mxu0 %vm43_vm0, %v28_v10 }
   0x9   :  { %412 = vmatprep.mubr.f32.mxu0 %v513_v3  ;;  %v33_v13 = vld [vmem:[#allocation2] sm:$0x1] }
   0xa   :  { %226 = vperm.xlu1 %496, %v33_v13  }
  0x82   :  { %v41_v14 = vpop.permute.xlu0 %40 }
  0x85   :  { %v605_v33 = vpop.permute.xlu1 %204 }
  0x86   :  { %v601_v28 = vpop.permute.xlu0 %122 }
  0x89   :  { %v227_v55 = vpop.permute.xlu1 %226 }
  0x8a   :  { %v232_v59 = vrot.slane %v227_v55, %v231_v53 }
  0xdb   :  { %v113_v15 = vpop.f32.mrb[0].mxu0 }
  0xdc   :  { %v114_v16 = vadd.f32 %v113_v15, %v41_v14  ;;  %v115_v17 = vpop.f32.mrb[1].mxu0 }
  0xdd   :  { %v116_v20 = vadd.f32 %v115_v17, %v41_v14 }
  0xde   :  { %v118_v25 = vmax.f32 %v114_v16, 0.0 }
  0xdf   :  { %v119_v23 = vmax.f32 %v116_v20, 0.0 }
  0xe1   :  { %129 = vmatprep.subr.mxu1 %v119_v23 }
  0xe2   :  { %130 = vmatpush1.msra.mxu1 %v118_v25 }
  0xe3   :  { %476 = vmatmul.mubr.msk.f32.vlgmr.msra.gmra.mrb[0].mxu1 %vm125_vm1, %v30_v26  ;;  %489 = vmatprep.subr.bf16.mxu1 %v488_v24 }
  0xe4   :  { %491 = vmatpush1.bf16.msra.mxu1 %v490_v27  ;;  %339 = vmatprep.mubr.f32.mxu1 %v513_v3 }
  0xe7   :  { %481 = vmatmul.mubr.msk.f32.vlgmr.msra.gmra.mrb[2].mxu1 %vm43_vm0, %v28_v10  ;;  %v251_v10 = vunpack.c.l.s4 %v515_v9 }
  0xe9   :  { %v252_v11 = vunpack.c.0.s8 %v251_v10 }
  0xeb   :  { %v255_v13 = vsub.s32 %v252_v11, %v230_v47 }
 0x1b6   :  { %v195_v29 = vpop.f32.mrb[0].mxu1 }
 0x1b7   :  { %v196_v30 = vadd.f32 %v195_v29, %v601_v28  ;;  %v197_v31 = vpop.f32.mrb[1].mxu1 }
 0x1b8   :  { %v198_v32 = vadd.f32 %v197_v31, %v601_v28 }
 0x1b9   :  { %v200_v34 = vmax.f32 %v196_v30, 0.0 }
 0x1ba   :  { %v201_v35 = vmax.f32 %v198_v32, 0.0  ;;  %v341_v36 = vpop.f32.mrb[2].mxu1 }
 0x1bb   :  { %v207_v38 = vmul.f32 %v605_v33, %v200_v34  ;;  %v342_v39 = vadd.f32 %v341_v36, %v41_v14  ;;  %v343_v40 = vpop.f32.mrb[3].mxu1 }
 0x1bc   :  { %v208_v41 = vmul.f32 %v605_v33, %v201_v35  ;;  %v344_v42 = vadd.f32 %v343_v40, %v41_v14 }
 0x1bd   :  { %v210_v43 = vsel %vm209_vm2, %v207_v38, 0.0  ;;  %v346_v49 = vmax.f32 %v342_v39, 0.0 }
 0x1be   :  { %v211_v44 = vrot.slane %v210_v43, 4  ;;  %v217_v45 = vsel %vm209_vm2, %v208_v41, 0.0  ;;  %v347_v46 = vmax.f32 %v344_v42, 0.0 }
 0x1bf   :  { %v218_v48 = vrot.slane %v217_v45, 4 }
 0x1c0   :  { %v212_v50 = vadd.f32 %v211_v44, %v210_v43  ;;  %348 = vmatprep.subr.mxu0 %v347_v46 }
 0x1c1   :  { %v219_v51 = vadd.f32 %v218_v48, %v217_v45  ;;  %349 = vmatpush1.msra.mxu0 %v346_v49 }
 0x1c2   :  { %v213_v52 = vrot.slane %v212_v50, 2  ;;  %482 = vmatmul.mubr.msk.f32.vlgmr.msra.gmra.mrb[2].mxu0 %vm125_vm1, %v30_v26 }
 0x1c3   :  { %v220_v54 = vrot.slane %v219_v51, 2 }
 0x1c4   :  { %v214_v56 = vadd.f32 %v213_v52, %v212_v50 }
 0x1c5   :  { %v221_v57 = vadd.f32 %v220_v54, %v219_v51 }
 0x1c6   :  { %v215_v58 = vrot.slane %v214_v56, 1 }
 0x1c7   :  { %v222_v60 = vrot.slane %v221_v57, 1 }
 0x1c8   :  { %v216_v61 = vadd.f32 %v215_v58, %v214_v56 }
 0x1c9   :  { %v223_v62 = vadd.f32 %v222_v60, %v221_v57 }
 0x1ca   :  { %v233_v63 = vadd.f32 %v232_v59, %v216_v61 }
 0x1cb   :  { %v234_v0 = vadd.f32 %v232_v59, %v223_v62 }
 0x1cc   :  { %v235_v1 = vsub.f32 0.0, %v233_v63 }
 0x1cd   :  { %v236_v2 = vsub.f32 0.0, %v234_v0 }
 0x1ce   :  { %v237_v3 = vmul.f32 1.442695, %v235_v1 }
 0x1cf   :  { %v239_v4 = vmul.f32 1.442695, %v236_v2 }
 0x1d0   :  { %497 = vpow2.f32 %v237_v3 }
 0x1d1   :  { %499 = vpow2.f32 %v239_v4 }
 0x1da   :  { %v498_v5 = vpop.eup %497 }
 0x1db   :  { %v500_v6 = vpop.eup %499  ;;  %v241_v7 = vadd.f32 1.0, %v498_v5 }
 0x1dc   :  { %v242_v8 = vadd.f32 1.0, %v500_v6 }
 0x1dd   :  { %501 = vrcp.f32 %v241_v7 }
 0x1de   :  { %503 = vrcp.f32 %v242_v8 }
 0x1e7   :  { %v502_v12 = vpop.eup %501 }
 0x1e8   :  { %v504_v14 = vpop.eup %503 }
 0x1e9   :  { %v249_v15 = vcombine.low %v502_v12, %v504_v14 }
 0x1eb   :  { %v256_v16 = vrot.slane %v249_v15, %v255_v13 }
 0x1ed   :  { %v263_v18 = vrot.slane %v256_v16, %v255_v13 }
 0x1ef   :  { %269 = vst.msk [vmem:[%s639_s7] sm:$0x3] %vm612_vm3, %v263_v18 }
 0x295   :  { %v414_v19 = vpop.f32.mrb[2].mxu0 }
 0x296   :  { %v415_v20 = vadd.f32 %v414_v19, %v601_v28  ;;  %v416_v21 = vpop.f32.mrb[3].mxu0 }
 0x297   :  { %v417_v22 = vadd.f32 %v416_v21, %v601_v28 }
 0x298   :  { %v419_v23 = vmax.f32 %v415_v20, 0.0 }
 0x299   :  { %v420_v24 = vmax.f32 %v417_v22, 0.0 }
 0x29a   :  { %v421_v25 = vmul.f32 %v419_v23, %v605_v33 }
 0x29b   :  { %v422_v26 = vmul.f32 %v420_v24, %v605_v33 }
 0x29c   :  { %v423_v27 = vsel %vm209_vm2, %v421_v25, 0.0 }
 0x29d   :  { %v424_v29 = vrot.slane %v423_v27, 4  ;;  %v430_v30 = vsel %vm209_vm2, %v422_v26, 0.0 }
 0x29e   :  { %v431_v31 = vrot.slane %v430_v30, 4 }
 0x29f   :  { %v425_v32 = vadd.f32 %v424_v29, %v423_v27 }
 0x2a0   :  { %v432_v34 = vadd.f32 %v431_v31, %v430_v30 }
 0x2a1   :  { %v426_v35 = vrot.slane %v425_v32, 2 }
 0x2a2   :  { %v433_v36 = vrot.slane %v432_v34, 2 }
 0x2a3   :  { %v427_v37 = vadd.f32 %v426_v35, %v425_v32 }
 0x2a4   :  { %v434_v38 = vadd.f32 %v433_v36, %v432_v34 }
 0x2a5   :  { %v428_v39 = vrot.slane %v427_v37, 1 }
 0x2a6   :  { %v435_v28 = vrot.slane %v434_v38, 1 }
 0x2a7   :  { %v429_v40 = vadd.f32 %v428_v39, %v427_v37 }
 0x2a8   :  { %v436_v41 = vadd.f32 %v435_v28, %v434_v38 }
 0x2a9   :  { %v437_v42 = vadd.f32 %v429_v40, %v232_v59 }
 0x2aa   :  { %v438_v43 = vadd.f32 %v436_v41, %v232_v59 }
 0x2ab   :  { %v439_v44 = vsub.f32 0.0, %v437_v42 }
 0x2ac   :  { %v440_v33 = vsub.f32 0.0, %v438_v43 }
 0x2ad   :  { %v441_v45 = vmul.f32 1.442695, %v439_v44 }
 0x2ae   :  { %v443_v46 = vmul.f32 1.442695, %v440_v33 }
 0x2af   :  { %505 = vpow2.f32 %v441_v45 }
 0x2b0   :  { %507 = vpow2.f32 %v443_v46 }
 0x2b9   :  { %v506_v47 = vpop.eup %505 }
 0x2ba   :  { %v508_v48 = vpop.eup %507  ;;  %v445_v49 = vadd.f32 1.0, %v506_v47 }
 0x2bb   :  { %v446_v50 = vadd.f32 1.0, %v508_v48 }
 0x2bc   :  { %509 = vrcp.f32 %v445_v49 }
 0x2bd   :  { %511 = vrcp.f32 %v446_v50 }
 0x2c6   :  { %v510_v51 = vpop.eup %509 }
 0x2c7   :  { %v512_v52 = vpop.eup %511 }
 0x2c8   :  { %v453_v53 = vcombine.low %v510_v51, %v512_v52 }
 0x2ca   :  { %v460_v54 = vrot.slane %v453_v53, %v255_v13 }
 0x2cc   :  { %v467_v55 = vrot.slane %v460_v54, %v255_v13 }
 0x2ce   :  { %483 = vst.msk [vmem:[%s639_s7 + $0x2] sm:$0x3] %vm612_vm3, %v467_v55 }

</bundles_post_ra>
